<compile_context>
chip_gen: v7x
topology: tpu7x:2x2x1
jax: 0.10.0
libtpu: 0.0.40
codegen_flags: <defaults>
</compile_context>

<pallas_src>
import functools

import jax
import jax.numpy as jnp
from jax.experimental import pallas as pl
from jax.experimental.pallas import tpu as pltpu


def _round_up(x, m):
    return (x + m - 1) // m * m


def _pad_lanes(a, width):
    return jnp.pad(a, ((0, 0), (0, width - a.shape[1])))


# ----------------------------------------------------------------------------
# Fused forward kernel: all GNN_EBM_Layer_01 layers + fused node/edge readout
# ----------------------------------------------------------------------------
def _fused_forward_kernel(x1_ref, x2_ref, graph_ref, w_ref, b_ref, out_ref,
                          *, n_layers, B, T, M, d):
    f32 = jnp.float32
    bf16 = jnp.bfloat16
    BT, BM = B * T, B * M
    d2, d4 = 2 * d, 4 * d
    goff = _round_up(BT, 16)          # Gstack row offset inside the graph slab
    lrows = 14 * d                    # weight-slab rows per layer (2d+4d+4d+4d)

    x1 = x1_ref[...]                                   # (BT, 2d) bf16
    x2 = x2_ref[...]                                   # (BM, 4d) bf16
    sb = graph_ref[0:BT, 0:BM]                         # (BT, BM) bf16
    g = graph_ref[goff:goff + 2 * BM, 0:BT]            # (2BM, BT) bf16

    for l in range(n_layers):
        base = l * lrows
        wn2 = w_ref[base:base + d2, 0:d2]              # (2d, 2d)
        agg_wn = w_ref[base + d2:base + 6 * d, 0:d2]   # (4d, 2d) = kron(mask_agg, Wn)
        wmIJe = w_ref[base + 6 * d:base + 10 * d, :]   # (4d, 4d) = [Wm@We folded, i/j]
        we4 = w_ref[base + 10 * d:base + 14 * d, :]    # (4d, 4d)
        bn2 = b_ref[2 * l:2 * l + 1, 0:d2]             # (1, 2d)  f32
        bme = b_ref[2 * l + 1:2 * l + 2, 0:d4]         # (1, 4d)  f32

        # ---- node path: x1' = x1@Wn2 + (Sb@x2)@agg_wn + bn2 ----
        sbx2 = jnp.dot(sb, x2, preferred_element_type=f32).astype(bf16)   # (BT, 4d)
        x1_new = (jnp.dot(x1, wn2, preferred_element_type=f32)
                  + jnp.dot(sbx2, agg_wn, preferred_element_type=f32)
                  + bn2)                                                   # (BT, 2d) f32
        if l < n_layers - 1:                                               # F.relu
            x1_new = jnp.maximum(x1_new, 0.0)

        # ---- edge path (uses pre-update x1): x2' = x2@We4 + [a|b]@wmIJe + bme ----
        gh = jnp.dot(g, x1, preferred_element_type=f32)                    # (2BM, 2d) f32
        ab = jnp.concatenate([gh[:BM], gh[BM:]], axis=1).astype(bf16)      # (BM, 4d)
        x2_new = (jnp.dot(x2, we4, preferred_element_type=f32)
                  + jnp.dot(ab, wmIJe, preferred_element_type=f32)
                  + bme)                                                   # (BM, 4d) f32

        x1 = x1_new.astype(bf16)
        x2 = x2_new.astype(bf16)

    # ---- fused readout: one matmul, one output slab ----
    ro = n_layers * lrows
    wro = w_ref[ro:ro + d4, 0:8]                       # (4d, 8) bf16
    bro = b_ref[2 * n_layers:2 * n_layers + 1, 0:8]    # (1, 8)  f32
    x1p = jnp.concatenate([x1, jnp.zeros((BT, d2), dtype=bf16)], axis=1)   # (BT, 4d)
    xcat = jnp.concatenate([x1p, x2], axis=0)                              # (BT+BM, 4d)
    out_ref[...] = jnp.dot(xcat, wro, preferred_element_type=f32) + bro


# ----------------------------------------------------------------------------
# Builder: hoists ALL constant construction out of the hot path, returns a
# jitted apply(x_1st, x_2nd) that does only reshape/cast + one pallas_call.
# ----------------------------------------------------------------------------
def make_gnn_energy_forward(edge, params, *, B, T, M, d):
    f32, bf16 = jnp.float32, jnp.bfloat16
    n_layers = len(params["layers"])
    BT, BM = B * T, B * M
    d2, d4 = 2 * d, 4 * d

    # ---- graph structure slab (values are 0 / 0.5 / 1 -> exact in bf16) ----
    t_range = jnp.arange(T, dtype=jnp.int32)
    e0, e1 = edge[0], edge[1]
    S = 0.5 * ((e1[None, :] == t_range[:, None]).astype(f32)
               + (e0[None, :] == t_range[:, None]).astype(f32))           # (T, M)
    Gi = (e0[:, None] == t_range[None, :]).astype(f32)                    # (M, T)
    Gj = (e1[:, None] == t_range[None, :]).astype(f32)                    # (M, T)
    eyeB = jnp.eye(B, dtype=f32)
    Sb = jnp.kron(eyeB, S)                                                # (BT, BM)
    Gstack = jnp.concatenate([jnp.kron(eyeB, Gi), jnp.kron(eyeB, Gj)], 0)  # (2BM, BT)

    goff = _round_up(BT, 16)
    gw = max(BM, BT)
    graph = jnp.zeros((goff + 2 * BM, gw), f32)
    graph = graph.at[:BT, :BM].set(Sb)
    graph = graph.at[goff:goff + 2 * BM, :BT].set(Gstack)
    graph = graph.astype(bf16)

    # ---- weight / bias slabs with trailing linears pre-folded ----
    mask_agg = jnp.array([[1., 0.], [1., 0.], [0., 1.], [0., 1.]], f32)   # k -> sign
    mask_i = jnp.array([[1., 1., 0., 0.], [0., 0., 1., 1.]], f32)         # node_i=[0,0,1,1]
    mask_j = jnp.array([[1., 0., 1., 0.], [0., 1., 0., 1.]], f32)         # node_j=[0,1,0,1]
    eye2 = jnp.eye(2, dtype=f32)
    eye4 = jnp.eye(4, dtype=f32)

    w_rows, b_rows = [], []
    for (wn, bn, we, be, wm, bm) in params["layers"]:
        wn2 = jnp.kron(eye2, wn)                       # (2d, 2d)
        we4 = jnp.kron(eye4, we)                       # (4d, 4d)
        agg_wn = jnp.kron(mask_agg, wn)                # (4d, 2d)  = aggsel @ Wn2
        wme = wm @ we                                  # fold mlp into edge_layer
        wmIJe = jnp.concatenate([jnp.kron(mask_i, wme),
                                 jnp.kron(mask_j, wme)], axis=0)          # (4d, 4d)
        bn2 = jnp.tile(bn, (1, 2))                     # (1, 2d)
        bme = jnp.tile(bm @ we + be, (1, 4))           # (1, 4d)  = bm4@We4 + be4

        w_rows += [_pad_lanes(wn2, d4), _pad_lanes(agg_wn, d4), wmIJe, we4]
        b_rows += [_pad_lanes(bn2, d4), bme]

    wron, bron = params["node_readout"]                # (2d, 2), (1, 2)
    wroe, broe = params["edge_readout"]                # (4d, 4), (1, 4)
    wro = jnp.zeros((d4, d4), f32)
    wro = wro.at[:d2, 0:2].set(wron)                   # node logits -> cols 0:2
    wro = wro.at[:, 4:8].set(wroe)                     # edge logits -> cols 4:8
    bro = jnp.zeros((1, d4), f32)
    bro = bro.at[:, 0:2].set(bron)
    bro = bro.at[:, 4:8].set(broe)
    w_rows.append(wro)
    b_rows.append(bro)

    w_slab = jnp.concatenate(w_rows, axis=0).astype(bf16)   # (n_layers*14d + 4d, 4d)
    b_slab = jnp.concatenate(b_rows, axis=0).astype(f32)    # (2*n_layers + 1, 4d)

    # ---- advisory cost estimate ----
    per_layer_flops = 2 * (BT * BM * d4            # Sb @ x2
                           + BT * d2 * d2          # x1 @ Wn2
                           + BT * d4 * d2          # sbx2 @ agg_wn
                           + 2 * BM * BT * d2      # Gstack @ x1
                           + BM * d4 * d4          # x2 @ We4
                           + BM * d4 * d4)         # [a|b] @ wmIJe
    flops = n_layers * per_layer_flops + 2 * (BT + BM) * d4 * 8
    bytes_accessed = (sum(int(a.size) * a.dtype.itemsize
                          for a in (graph, w_slab, b_slab))
                      + (BT * d2 + BM * d4) * 2 + (BT + BM) * 8 * 4)

    kernel = functools.partial(_fused_forward_kernel,
                               n_layers=n_layers, B=B, T=T, M=M, d=d)
    vmem_spec = pl.BlockSpec(memory_space=pltpu.MemorySpace.VMEM)
    fused_call = pl.pallas_call(
        kernel,
        out_shape=jax.ShapeDtypeStruct((BT + BM, 8), jnp.float32),
        in_specs=[vmem_spec] * 5,
        out_specs=vmem_spec,
        compiler_params=pltpu.CompilerParams(vmem_limit_bytes=32 * 1024 * 1024),
        cost_estimate=pl.CostEstimate(flops=int(flops), transcendentals=0,
                                      bytes_accessed=int(bytes_accessed)),
    )

    @jax.jit
    def apply(x_1st, x_2nd):
        x1 = x_1st.reshape(BT, d2).astype(bf16)
        x2 = x_2nd.reshape(BM, d4).astype(bf16)
        out = fused_call(x1, x2, graph, w_slab, b_slab)     # (BT+BM, 8) f32
        h_node = out[:BT, 0:2].reshape(B, T, 2)
        h_edge = out[BT:, 4:8].reshape(B, M, 4)
        return h_node, h_edge

    return apply


def gnn_energy_model_forward(x_1st, x_2nd, edge, params):
    """One-shot convenience wrapper (rebuilds constants every call)."""
    B, T = x_1st.shape[:2]
    M = edge.shape[1]
    d = x_1st.shape[-1]
    return make_gnn_energy_forward(edge, params, B=B, T=T, M=M, d=d)(x_1st, x_2nd)


# ----------------------------------------------------------------------------
# Pure-JAX f32 reference (matches the PyTorch module semantics) for validation
# ----------------------------------------------------------------------------
def _ref_layer(x1, x2, edge, lp, apply_relu):
    wn, bn, we, be, wm, bm = lp
    B, T, _, d = x1.shape
    x2_agg0 = x2[:, :, 0] + x2[:, :, 1]
    x2_agg1 = x2[:, :, 2] + x2[:, :, 3]

    def mp(x, x2a):
        s_out = jnp.zeros((B, T, d), jnp.float32).at[:, edge[1], :].add(x2a)
        s_in = jnp.zeros((B, T, d), jnp.float32).at[:, edge[0], :].add(x2a)
        return x + (s_out + s_in) / 2.0

    x_neg = mp(x1[:, :, 0], x2_agg0)
    x_pos = mp(x1[:, :, 1], x2_agg1)
    xn = jnp.stack([x_neg, x_pos], axis=2) @ wn + bn[0]
    if apply_relu:
        xn = jnp.maximum(xn, 0.0)
    edge_i = x1[:, edge[0]][:, :, jnp.array([0, 0, 1, 1])]
    edge_j = x1[:, edge[1]][:, :, jnp.array([0, 1, 0, 1])]
    e = x2 + ((edge_i + edge_j) @ wm + bm[0])
    e = e @ we + be[0]
    return xn, e


def _ref_forward(x_1st, x_2nd, edge, params):
    B, T = x_1st.shape[:2]
    M = edge.shape[1]
    d = x_1st.shape[-1]
    layers = params["layers"]
    x_node, x_edge = x_1st, x_2nd
    for i, lp in enumerate(layers):
        x_node, x_edge = _ref_layer(x_node, x_edge, edge, lp,
                                    apply_relu=(i < len(layers) - 1))
    hn = x_node.reshape(B, T, 2 * d) @ params["node_readout"][0] \
        + params["node_readout"][1][0]
    he = x_edge.reshape(B, M, 4 * d) @ params["edge_readout"][0] \
        + params["edge_readout"][1][0]
    return hn, he


# ----------------------------------------------------------------------------
# Deterministic parameter construction
# ----------------------------------------------------------------------------
def init_params(key, d, layer_num):
    n_gnn_layers = layer_num - 1
    layers = []
    for _ in range(n_gnn_layers):
        keys = jax.random.split(key, 7)
        key = keys[0]
        wn = 0.1 * jax.random.normal(keys[1], (d, d), jnp.float32)
        bn = 0.1 * jax.random.normal(keys[2], (1, d), jnp.float32)
        we = 0.1 * jax.random.normal(keys[3], (d, d), jnp.float32)
        be = 0.1 * jax.random.normal(keys[4], (1, d), jnp.float32)
        wm = 0.1 * jax.random.normal(keys[5], (d, d), jnp.float32)
        bm = 0.1 * jax.random.normal(keys[6], (1, d), jnp.float32)
        layers.append((wn, bn, we, be, wm, bm))
    keys = jax.random.split(key, 5)
    node_ro = (0.1 * jax.random.normal(keys[1], (2 * d, 2), jnp.float32),
               0.1 * jax.random.normal(keys[2], (1, 2), jnp.float32))
    edge_ro = (0.1 * jax.random.normal(keys[3], (4 * d, 4), jnp.float32),
               0.1 * jax.random.normal(keys[4], (1, 4), jnp.float32))
    return {"layers": layers, "node_readout": node_ro, "edge_readout": edge_ro}


if __name__ == "__main__":
    B, T, M, d = 2, 8, 12, 32
    ebm_GNN_layer_num = 3            # -> 2 GNN_EBM_Layer_01 layers

    key = jax.random.PRNGKey(0)
    k1, k2, k3, kp = jax.random.split(key, 4)
    x_1st = jax.random.normal(k1, (B, T, 2, d), jnp.float32)
    x_2nd = jax.random.normal(k2, (B, M, 4, d), jnp.float32)
    edge = jax.random.randint(k3, (2, M), 0, T, jnp.int32)

    params = init_params(kp, d, ebm_GNN_layer_num)

    fwd = make_gnn_energy_forward(edge, params, B=B, T=T, M=M, d=d)
    h_node, h_edge = fwd(x_1st, x_2nd)
    jax.block_until_ready((h_node, h_edge))

    ref_node, ref_edge = _ref_forward(x_1st, x_2nd, edge, params)
    assert h_node.shape == (B, T, 2) and h_edge.shape == (B, M, 4)
    # bf16 operands / f32 accumulation -> slightly looser tolerance than pure f32
    assert jnp.allclose(h_node, ref_node, rtol=2e-2, atol=2e-2)
    assert jnp.allclose(h_edge, ref_edge, rtol=2e-2, atol=2e-2)

    print("KERNEL_OK")
</pallas_src>

<mosaic_0001>
module attributes {stable_mosaic.version = 11 : i64} {
  func.func @_fused_forward_kernel(%arg0: memref<16x64xbf16, #tpu.memory_space<vmem>>, %arg1: memref<24x128xbf16, #tpu.memory_space<vmem>>, %arg2: memref<64x24xbf16, #tpu.memory_space<vmem>>, %arg3: memref<1024x128xbf16, #tpu.memory_space<vmem>>, %arg4: memref<5x128xf32, #tpu.memory_space<vmem>>, %arg5: memref<40x8xf32, #tpu.memory_space<vmem>>) attributes {dimension_semantics = [], scalar_prefetch = 0 : i64, scratch_operands = 0 : i64, tpu.core_type = #tpu.core_type<tc>} {
    %c0 = arith.constant 0 : index
    %c0_0 = arith.constant 0 : index
    %0 = vector.load %arg0[%c0, %c0_0] : memref<16x64xbf16, #tpu.memory_space<vmem>>, vector<16x64xbf16>
    %c0_1 = arith.constant 0 : index
    %c0_2 = arith.constant 0 : index
    %1 = vector.load %arg1[%c0_1, %c0_2] : memref<24x128xbf16, #tpu.memory_space<vmem>>, vector<24x128xbf16>
    %c0_3 = arith.constant 0 : index
    %c0_4 = arith.constant 0 : index
    %2 = vector.load %arg2[%c0_3, %c0_4] : memref<64x24xbf16, #tpu.memory_space<vmem>>, vector<16x24xbf16>
    %c16 = arith.constant 16 : index
    %c0_5 = arith.constant 0 : index
    %3 = vector.load %arg2[%c16, %c0_5] : memref<64x24xbf16, #tpu.memory_space<vmem>>, vector<48x16xbf16>
    %c0_6 = arith.constant 0 : index
    %c0_7 = arith.constant 0 : index
    %4 = vector.load %arg3[%c0_6, %c0_7] : memref<1024x128xbf16, #tpu.memory_space<vmem>>, vector<64x64xbf16>
    %c64 = arith.constant 64 : index
    %c0_8 = arith.constant 0 : index
    %5 = vector.load %arg3[%c64, %c0_8] : memref<1024x128xbf16, #tpu.memory_space<vmem>>, vector<128x64xbf16>
    %c192 = arith.constant 192 : index
    %c0_9 = arith.constant 0 : index
    %6 = vector.load %arg3[%c192, %c0_9] : memref<1024x128xbf16, #tpu.memory_space<vmem>>, vector<128x128xbf16>
    %c320 = arith.constant 320 : index
    %c0_10 = arith.constant 0 : index
    %7 = vector.load %arg3[%c320, %c0_10] : memref<1024x128xbf16, #tpu.memory_space<vmem>>, vector<128x128xbf16>
    %c0_11 = arith.constant 0 : index
    %c0_12 = arith.constant 0 : index
    %8 = vector.load %arg4[%c0_11, %c0_12] : memref<5x128xf32, #tpu.memory_space<vmem>>, vector<1x64xf32>
    %c1 = arith.constant 1 : index
    %c0_13 = arith.constant 0 : index
    %9 = vector.load %arg4[%c1, %c0_13] : memref<5x128xf32, #tpu.memory_space<vmem>>, vector<1x128xf32>
    %cst = arith.constant dense<0.000000e+00> : vector<16x128xf32>
    %10 = tpu.matmul %2, %1, %cst {dimension_numbers = #tpu.dot_dimension_numbers<[1], [0], [0], [1], [0, 0, 1, 1], [], []>} : vector<16x24xbf16>, vector<24x128xbf16>, vector<16x128xf32> -> vector<16x128xf32>
    %11 = arith.truncf %10 : vector<16x128xf32> to vector<16x128xbf16>
    %cst_14 = arith.constant dense<0.000000e+00> : vector<16x64xf32>
    %12 = tpu.matmul %0, %4, %cst_14 {dimension_numbers = #tpu.dot_dimension_numbers<[1], [0], [0], [1], [0, 0, 1, 1], [], []>} : vector<16x64xbf16>, vector<64x64xbf16>, vector<16x64xf32> -> vector<16x64xf32>
    %cst_15 = arith.constant dense<0.000000e+00> : vector<16x64xf32>
    %13 = tpu.matmul %11, %5, %cst_15 {dimension_numbers = #tpu.dot_dimension_numbers<[1], [0], [0], [1], [0, 0, 1, 1], [], []>} : vector<16x128xbf16>, vector<128x64xbf16>, vector<16x64xf32> -> vector<16x64xf32>
    %14 = arith.addf %12, %13 : vector<16x64xf32>
    %15 = vector.broadcast %8 : vector<1x64xf32> to vector<16x64xf32>
    %16 = arith.addf %14, %15 : vector<16x64xf32>
    %cst_16 = arith.constant 0.000000e+00 : f32
    %17 = vector.broadcast %cst_16 : f32 to vector<16x64xf32>
    %18 = arith.maximumf %16, %17 : vector<16x64xf32>
    %cst_17 = arith.constant dense<0.000000e+00> : vector<48x64xf32>
    %19 = tpu.matmul %3, %0, %cst_17 {dimension_numbers = #tpu.dot_dimension_numbers<[1], [0], [0], [1], [0, 0, 1, 1], [], []>} : vector<48x16xbf16>, vector<16x64xbf16>, vector<48x64xf32> -> vector<48x64xf32>
    %20 = vector.extract_strided_slice %19 {offsets = [0, 0], sizes = [24, 64], strides = [1, 1]} : vector<48x64xf32> to vector<24x64xf32>
    %21 = vector.extract_strided_slice %19 {offsets = [24, 0], sizes = [24, 64], strides = [1, 1]} : vector<48x64xf32> to vector<24x64xf32>
    %22 = tpu.concatenate %20, %21 in 1 : vector<24x64xf32>, vector<24x64xf32> -> vector<24x128xf32>
    %23 = arith.truncf %22 : vector<24x128xf32> to vector<24x128xbf16>
    %cst_18 = arith.constant dense<0.000000e+00> : vector<24x128xf32>
    %24 = tpu.matmul %1, %7, %cst_18 {dimension_numbers = #tpu.dot_dimension_numbers<[1], [0], [0], [1], [0, 0, 1, 1], [], []>} : vector<24x128xbf16>, vector<128x128xbf16>, vector<24x128xf32> -> vector<24x128xf32>
    %cst_19 = arith.constant dense<0.000000e+00> : vector<24x128xf32>
    %25 = tpu.matmul %23, %6, %cst_19 {dimension_numbers = #tpu.dot_dimension_numbers<[1], [0], [0], [1], [0, 0, 1, 1], [], []>} : vector<24x128xbf16>, vector<128x128xbf16>, vector<24x128xf32> -> vector<24x128xf32>
    %26 = arith.addf %24, %25 : vector<24x128xf32>
    %27 = vector.broadcast %9 : vector<1x128xf32> to vector<24x128xf32>
    %28 = arith.addf %26, %27 : vector<24x128xf32>
    %29 = arith.truncf %18 : vector<16x64xf32> to vector<16x64xbf16>
    %30 = arith.truncf %28 : vector<24x128xf32> to vector<24x128xbf16>
    %c448 = arith.constant 448 : index
    %c0_20 = arith.constant 0 : index
    %31 = vector.load %arg3[%c448, %c0_20] : memref<1024x128xbf16, #tpu.memory_space<vmem>>, vector<64x64xbf16>
    %c512 = arith.constant 512 : index
    %c0_21 = arith.constant 0 : index
    %32 = vector.load %arg3[%c512, %c0_21] : memref<1024x128xbf16, #tpu.memory_space<vmem>>, vector<128x64xbf16>
    %c640 = arith.constant 640 : index
    %c0_22 = arith.constant 0 : index
    %33 = vector.load %arg3[%c640, %c0_22] : memref<1024x128xbf16, #tpu.memory_space<vmem>>, vector<128x128xbf16>
    %c768 = arith.constant 768 : index
    %c0_23 = arith.constant 0 : index
    %34 = vector.load %arg3[%c768, %c0_23] : memref<1024x128xbf16, #tpu.memory_space<vmem>>, vector<128x128xbf16>
    %c2 = arith.constant 2 : index
    %c0_24 = arith.constant 0 : index
    %35 = vector.load %arg4[%c2, %c0_24] : memref<5x128xf32, #tpu.memory_space<vmem>>, vector<1x64xf32>
    %c3 = arith.constant 3 : index
    %c0_25 = arith.constant 0 : index
    %36 = vector.load %arg4[%c3, %c0_25] : memref<5x128xf32, #tpu.memory_space<vmem>>, vector<1x128xf32>
    %cst_26 = arith.constant dense<0.000000e+00> : vector<16x128xf32>
    %37 = tpu.matmul %2, %30, %cst_26 {dimension_numbers = #tpu.dot_dimension_numbers<[1], [0], [0], [1], [0, 0, 1, 1], [], []>} : vector<16x24xbf16>, vector<24x128xbf16>, vector<16x128xf32> -> vector<16x128xf32>
    %38 = arith.truncf %37 : vector<16x128xf32> to vector<16x128xbf16>
    %cst_27 = arith.constant dense<0.000000e+00> : vector<16x64xf32>
    %39 = tpu.matmul %29, %31, %cst_27 {dimension_numbers = #tpu.dot_dimension_numbers<[1], [0], [0], [1], [0, 0, 1, 1], [], []>} : vector<16x64xbf16>, vector<64x64xbf16>, vector<16x64xf32> -> vector<16x64xf32>
    %cst_28 = arith.constant dense<0.000000e+00> : vector<16x64xf32>
    %40 = tpu.matmul %38, %32, %cst_28 {dimension_numbers = #tpu.dot_dimension_numbers<[1], [0], [0], [1], [0, 0, 1, 1], [], []>} : vector<16x128xbf16>, vector<128x64xbf16>, vector<16x64xf32> -> vector<16x64xf32>
    %41 = arith.addf %39, %40 : vector<16x64xf32>
    %42 = vector.broadcast %35 : vector<1x64xf32> to vector<16x64xf32>
    %43 = arith.addf %41, %42 : vector<16x64xf32>
    %cst_29 = arith.constant dense<0.000000e+00> : vector<48x64xf32>
    %44 = tpu.matmul %3, %29, %cst_29 {dimension_numbers = #tpu.dot_dimension_numbers<[1], [0], [0], [1], [0, 0, 1, 1], [], []>} : vector<48x16xbf16>, vector<16x64xbf16>, vector<48x64xf32> -> vector<48x64xf32>
    %45 = vector.extract_strided_slice %44 {offsets = [0, 0], sizes = [24, 64], strides = [1, 1]} : vector<48x64xf32> to vector<24x64xf32>
    %46 = vector.extract_strided_slice %44 {offsets = [24, 0], sizes = [24, 64], strides = [1, 1]} : vector<48x64xf32> to vector<24x64xf32>
    %47 = tpu.concatenate %45, %46 in 1 : vector<24x64xf32>, vector<24x64xf32> -> vector<24x128xf32>
    %48 = arith.truncf %47 : vector<24x128xf32> to vector<24x128xbf16>
    %cst_30 = arith.constant dense<0.000000e+00> : vector<24x128xf32>
    %49 = tpu.matmul %30, %34, %cst_30 {dimension_numbers = #tpu.dot_dimension_numbers<[1], [0], [0], [1], [0, 0, 1, 1], [], []>} : vector<24x128xbf16>, vector<128x128xbf16>, vector<24x128xf32> -> vector<24x128xf32>
    %cst_31 = arith.constant dense<0.000000e+00> : vector<24x128xf32>
    %50 = tpu.matmul %48, %33, %cst_31 {dimension_numbers = #tpu.dot_dimension_numbers<[1], [0], [0], [1], [0, 0, 1, 1], [], []>} : vector<24x128xbf16>, vector<128x128xbf16>, vector<24x128xf32> -> vector<24x128xf32>
    %51 = arith.addf %49, %50 : vector<24x128xf32>
    %52 = vector.broadcast %36 : vector<1x128xf32> to vector<24x128xf32>
    %53 = arith.addf %51, %52 : vector<24x128xf32>
    %54 = arith.truncf %43 : vector<16x64xf32> to vector<16x64xbf16>
    %55 = arith.truncf %53 : vector<24x128xf32> to vector<24x128xbf16>
    %c896 = arith.constant 896 : index
    %c0_32 = arith.constant 0 : index
    %56 = vector.load %arg3[%c896, %c0_32] : memref<1024x128xbf16, #tpu.memory_space<vmem>>, vector<128x8xbf16>
    %c4 = arith.constant 4 : index
    %c0_33 = arith.constant 0 : index
    %57 = vector.load %arg4[%c4, %c0_33] : memref<5x128xf32, #tpu.memory_space<vmem>>, vector<1x8xf32>
    %cst_34 = arith.constant 0.000000e+00 : bf16
    %58 = vector.broadcast %cst_34 : bf16 to vector<16x64xbf16>
    %59 = tpu.concatenate %54, %58 in 1 : vector<16x64xbf16>, vector<16x64xbf16> -> vector<16x128xbf16>
    %60 = tpu.concatenate %59, %55 in 0 : vector<16x128xbf16>, vector<24x128xbf16> -> vector<40x128xbf16>
    %cst_35 = arith.constant dense<0.000000e+00> : vector<40x8xf32>
    %61 = tpu.matmul %60, %56, %cst_35 {dimension_numbers = #tpu.dot_dimension_numbers<[1], [0], [0], [1], [0, 0, 1, 1], [], []>} : vector<40x128xbf16>, vector<128x8xbf16>, vector<40x8xf32> -> vector<40x8xf32>
    %62 = vector.broadcast %57 : vector<1x8xf32> to vector<40x8xf32>
    %63 = arith.addf %61, %62 : vector<40x8xf32>
    %c0_36 = arith.constant 0 : index
    %c0_37 = arith.constant 0 : index
    %64 = vector.load %arg5[%c0_36, %c0_37] : memref<40x8xf32, #tpu.memory_space<vmem>>, vector<40x8xf32>
    tpu.vector_store %arg5[%c0_36, %c0_37], %63 {strides = array<i32>} : memref<40x8xf32, #tpu.memory_space<vmem>>, vector<40x8xf32>,
    return
  }
}

</mosaic_0001>

<bundles_post_ra>
// kernel: apply.1
= control target key start
LH: loop header
LB: loop body
LE: loop exit
PB: predicated region body
PF: predicated region fallthrough
CT: control target
= control target key end

     0   :  { %10 = vsyncpa [#allocation3], 0  ;;  %s1832_s18 = smov [#allocation2]   ;;  %s2075_s0 = inlined_call_operand.vmem [shape: bf16[16,64], index: 0, kind: input, shape index: {}]   ;;  %s2076_s1 = inlined_call_operand.vmem [shape: bf16[24,128], index: 1, kind: input, shape index: {}]   ;;  %s2077_s2 = inlined_call_operand.vmem [shape: bf16[64,24], index: 2, kind: input, shape index: {}]   ;;  %s2078_s3 = inlined_call_operand.hbm [shape: bf16[1024,128], index: 3, kind: input, shape index: {}]   ;;  %s2079_s4 = inlined_call_operand.vmem [shape: f32[5,128], index: 4, kind: input, shape index: {}]   ;;  %s2080_s5 = inlined_call_operand.vmem [shape: f32[40,8], index: 5, kind: output, shape index: {}]  }
   0x1   :  { %s22_s19 = sshll.u32 %s1832_s18, 4  ;;  %s1808_s22 = scalar_lea.hbm %s2078_s3, 8192  ;;  %s23_s19 = int_to_ptr.vmem [resolvable:$true] %s22_s19 }
   0x2   :  { %p1809_p0 = scmp.ne.s32.totalorder %s2078_s3, %s1808_s22  ;;  %p1812_p1 = scmp.lt.u32.totalorder %s1808_s22, %s2078_s3 }
   0x4   :  { %p1814_p2 = pnand %p1812_p1, %p1809_p0 }
   0x6   :  { %1817 = shalt.err (!%p1814_p2)
}
   0x7   :  { %s1818_s27 = scalar_lea.vmem %s23_s19, 8192  ;;  %p1823_p4 = scmp.lt.s32.totalorder %s23_s19, %s23_s19 }
   0x8   :  { %p1819_p3 = scmp.ne.s32.totalorder %s23_s19, %s1818_s27  ;;  %p1824_p5 = scmp.lt.s32.totalorder %s1818_s27, %s1818_s27 }
   0xa   :  { %p1825_p6 = por %p1824_p5, %p1823_p4 }
   0xc   :  { %p1826_p7 = pnand %p1825_p6, %p1819_p3 }
   0xe   :  { %1829 = shalt.err (!%p1826_p7)
}
   0xf   :  { %s1833_s28 = smov 64   ;;  %s1834_s29 = smov 4  }
  0x10   :  { %28 = dma.hbm_to_vmem [thread:$0]  %s2078_s3, 8192, %s23_s19, [#allocation3], %s1833_s28, %s1833_s28, %s1834_s29  }
  0x11   :  { %1830 = dma.done.wait [#allocation3], 8192  }
  0x12   :  { %1831 = vsyncadd [#allocation3], 4294959104  ;;  %v1835_v0 = vmov 0.0   ;;  %vm1836_vm0 = vmmov 0   ;;  %v1890_v1 = vld [vmem:[%s2075_s0] sm:$0xff]   ;;  %v1895_v2 = vld [vmem:[%s2077_s2 + $0x8] sm:$0xff]  }
  0x13   :  { %1546 = vmatprep.subr.bf16.mxu0 %v1835_v0  ;;  %1548 = vmatprep.mubr.msk.bf16.mxu0 %vm1836_vm0, %v1835_v0  ;;  %vm357_vm1 = vcmask 130048   ;;  %v1901_v3 = vld [vmem:[%s2076_s1] sm:$0xff]   ;;  %vm124_vm2 = vcmask 1043456   ;;  %v1908_v4 = vld [vmem:[%s2076_s1 + $0x8] ss:$0 sps:$4 sm:$0xff]   ;;  %vm120_vm3 = vcmask 195584  }
  0x14   :  { %1506 = vmatprep.subr.bf16.mxu1 %v1835_v0  ;;  %1510 = vmatprep.mubr.msk.bf16.mxu1 %vm1836_vm0, %v1835_v0  ;;  %v1916_v5 = vld [vmem:[%s2077_s2 + $0x10] sm:$0xff]   ;;  %v126_v6 = vsel %vm124_vm2, %v1908_v4, 0  ;;  %v1924_v7 = vld [vmem:[%s2077_s2] sm:$0xff]   ;;  %v1938_v8 = vld [vmem:[%s2077_s2 + $0x18] sm:$0xff]   ;;  %vm288_vm4 = vcmask 523264   ;;  %vm1315_vm5 = vcmask 64512  }
  0x15   :  { %1547 = vmatpush3.bf16.msra.mxu0 %v1890_v1  ;;  %1507 = vmatpush3.bf16.msra.mxu1 %v1901_v3  ;;  %v1744_v9 = vld [vmem:[#allocation2 + $0x20] sm:$0xff]   ;;  %v1745_v10 = vld [vmem:[#allocation2 + $0x28] sm:$0xff]   ;;  %v1746_v11 = vld [vmem:[#allocation2 + $0x30] sm:$0xff]  }
  0x16   :  { %1508 = vmatprep.subr.bf16.mxu1 %v1835_v0  ;;  %v1757_v12 = vld [vmem:[#allocation2 + $0x60] sm:$0xff]   ;;  %v1747_v13 = vld [vmem:[#allocation2 + $0x38] sm:$0xff]   ;;  %v1759_v14 = vld [vmem:[#allocation2 + $0x68] sm:$0xff]  }
  0x17   :  { %1560 = vmatprep.subr.bf16.mxu0 %v1757_v12  ;;  %v1748_v15 = vld [vmem:[#allocation2 + $0x40] sm:$0xff]   ;;  %v1761_v16 = vld [vmem:[#allocation2 + $0x70] sm:$0xff]   ;;  %v1749_v17 = vld [vmem:[#allocation2 + $0x48] sm:$0xff]  }
  0x18   :  { %1549 = vmatmul.mubr.msk.bf16.vlgmr.msra.gmra.mrb[0].mxu0 %vm357_vm1, %v1895_v2  ;;  %v1763_v18 = vld [vmem:[#allocation2 + $0x78] sm:$0xff]   ;;  %v1750_v19 = vld [vmem:[#allocation2 + $0x50] sm:$0xff]   ;;  %v1765_v20 = vld [vmem:[#allocation2 + $0x80] sm:$0xff]  }
  0x19   :  { %1552 = vmatprep.mubr.msk.bf16.mxu0 %vm1836_vm0, %v1835_v0  ;;  %1509 = vmatpush3.bf16.msra.mxu1 %v126_v6  ;;  %v1751_v21 = vld [vmem:[#allocation2 + $0x58] sm:$0xff]   ;;  %v1767_v22 = vld [vmem:[#allocation2 + $0x88] sm:$0xff]   ;;  %v1769_v23 = vld [vmem:[#allocation2 + $0x90] sm:$0xff]  }
  0x1a   :  { %1514 = vmatprep.subr.bf16.mxu1 %v1835_v0  ;;  %1561 = vmatpush3.bf16.msra.mxu0 %v1757_v12  ;;  %v1771_v28 = vld [vmem:[#allocation2 + $0x98] sm:$0xff]   ;;  %v1752_v35 = vld [vmem:[#allocation2] sm:$0xff]   ;;  %v1753_v39 = vld [vmem:[#allocation2 + $0x8] sm:$0xff]  }
  0x1b   :  { %1562 = vmatprep.subr.bf16.mxu0 %v1759_v14  ;;  %v1754_v44 = vld [vmem:[#allocation2 + $0x10] sm:$0xff]   ;;  %v1755_v46 = vld [vmem:[#allocation2 + $0x18] sm:$0xff]   ;;  %v1756_v47 = vld [vmem:[#allocation2 + $0xa0] sm:$0xff]  }
  0x1c   :  { %1511 = vmatmul.mubr.msk.bf16.vlgmr.msra.gmra.mrb[0].mxu1 %vm120_vm3, %v1924_v7  ;;  %v1758_v48 = vld [vmem:[#allocation2 + $0xa8] sm:$0xff]   ;;  %v1760_v49 = vld [vmem:[#allocation2 + $0xb0] sm:$0xff]   ;;  %v1762_v50 = vld [vmem:[#allocation2 + $0xb8] sm:$0xff]  }
  0x1d   :  { %1530 = vmatprep.mubr.msk.bf16.mxu1 %vm1836_vm0, %v1835_v0  ;;  %1515 = vmatpush3.bf16.msra.mxu1 %v1744_v9  ;;  %v1764_v51 = vld [vmem:[#allocation2 + $0xc0] sm:$0xff]   ;;  %v1766_v52 = vld [vmem:[#allocation2 + $0xc8] sm:$0xff]   ;;  %v1768_v53 = vld [vmem:[#allocation2 + $0xd0] sm:$0xff]  }
  0x1e   :  { %1516 = vmatprep.subr.bf16.mxu1 %v1835_v0  ;;  %1563 = vmatpush3.bf16.msra.mxu0 %v1759_v14  ;;  %v1770_v54 = vld [vmem:[#allocation2 + $0xd8] sm:$0xff]   ;;  %v1344_v9 = vld [vmem:[%s2079_s4] ss:$0 sm:$0xff] }
  0x1f   :  { %1564 = vmatprep.subr.bf16.mxu0 %v1761_v16 }
  0x20   :  { %1553 = vmatmul.mubr.msk.bf16.gmra.mrb[4].mxu0 %vm357_vm1, %v1916_v5 }
  0x21   :  { %1556 = vmatprep.mubr.msk.bf16.mxu0 %vm1836_vm0, %v1835_v0  ;;  %1517 = vmatpush3.bf16.msra.mxu1 %v1745_v10 }
  0x22   :  { %1518 = vmatprep.subr.bf16.mxu1 %v1835_v0  ;;  %1565 = vmatpush3.bf16.msra.mxu0 %v1761_v16 }
  0x23   :  { %1566 = vmatprep.subr.bf16.mxu0 %v1763_v18 }
  0x25   :  { %1519 = vmatpush3.bf16.msra.mxu1 %v1746_v11 }
  0x26   :  { %1520 = vmatprep.subr.bf16.mxu1 %v1835_v0  ;;  %1567 = vmatpush3.bf16.msra.mxu0 %v1763_v18 }
  0x27   :  { %1568 = vmatprep.subr.bf16.mxu0 %v1765_v20 }
  0x28   :  { %1557 = vmatmul.mubr.msk.bf16.gmra.mrb[8].mxu0 %vm357_vm1, %v1938_v8 }
  0x29   :  { %1521 = vmatpush3.bf16.msra.mxu1 %v1747_v13 }
  0x2a   :  { %1522 = vmatprep.subr.bf16.mxu1 %v1835_v0  ;;  %1569 = vmatpush3.bf16.msra.mxu0 %v1765_v20 }
  0x2b   :  { %1570 = vmatprep.subr.bf16.mxu0 %v1767_v22 }
  0x2d   :  { %1523 = vmatpush3.bf16.msra.mxu1 %v1748_v15 }
  0x2e   :  { %1524 = vmatprep.subr.bf16.mxu1 %v1835_v0  ;;  %1571 = vmatpush3.bf16.msra.mxu0 %v1767_v22 }
  0x2f   :  { %1572 = vmatprep.subr.bf16.mxu0 %v1769_v23 }
  0x31   :  { %1525 = vmatpush3.bf16.msra.mxu1 %v1749_v17 }
  0x32   :  { %1526 = vmatprep.subr.bf16.mxu1 %v1835_v0  ;;  %1573 = vmatpush3.bf16.msra.mxu0 %v1769_v23 }
  0x33   :  { %1574 = vmatprep.subr.bf16.mxu0 %v1771_v28 }
  0x35   :  { %1527 = vmatpush3.bf16.msra.mxu1 %v1750_v19 }
  0x36   :  { %1528 = vmatprep.subr.bf16.mxu1 %v1835_v0  ;;  %1575 = vmatpush3.bf16.msra.mxu0 %v1771_v28  ;;  %v1779_v28 = vld [vmem:[#allocation2 + $0x118] sm:$0xff]  }
  0x37   :  { %1600 = vmatprep.subr.bf16.mxu0 %v1835_v0 }
  0x39   :  { %1529 = vmatpush3.bf16.msra.mxu1 %v1751_v21 }
  0x3a   :  { %1534 = vmatprep.subr.bf16.mxu1 %v1835_v0 }
  0xeb   :  { %v1950_v24 = vpop.f32.mrb[0].mxu0 }
  0xec   :  { %v1550_v25 = vpop.f32.mrb[1].mxu0 }
  0xed   :  { %v1952_v26 = vpop.f32.mrb[2].mxu0  ;;  %v1776_v25 = vld [vmem:[#allocation2 + $0x100] sm:$0xff]  }
  0xee   :  { %v1551_v27 = vpop.f32.mrb[3].mxu0 }
  0xef   :  { %v162_v30 = vpop.f32.mrb[0].mxu1  ;;  %v1778_v27 = vld [vmem:[#allocation2 + $0x110] sm:$0xff]  }
  0xf0   :  { %v1512_v32 = vpop.f32.mrb[1].mxu1 }
  0xf1   :  { %v165_v34 = vpop.f32.mrb[2].mxu1 }
  0xf2   :  { %v169_v37 = vpack.c.bf16 %v165_v34, %v162_v30  ;;  %v1513_v38 = vpop.f32.mrb[3].mxu1  ;;  %v1781_v30 = vld [vmem:[#allocation2 + $0x128] sm:$0xff]  }
  0xf3   :  { %v1954_v29 = vpop.f32.mrb[4].mxu0 }
  0xf4   :  { %v1554_v31 = vpop.f32.mrb[5].mxu0  ;;  %1531 = vmatmul.mubr.bf16.vlgmr.msra.gmra.mrb[4].mxu1 %v169_v37 }
  0xf5   :  { %v412_v33 = vpop.f32.mrb[6].mxu0  ;;  %1535 = vmatpush3.bf16.msra.mxu1 %v1752_v35  ;;  %1542 = vmatprep.mubr.msk.bf16.mxu1 %vm1836_vm0, %v1835_v0  ;;  %v1782_v31 = vld [vmem:[#allocation2 + $0x130] sm:$0xff]   ;;  %v1367_v35 = vld [vmem:[%s2079_s4 + $0x1] ss:$0 sm:$0xff] }
  0xf6   :  { %v1555_v36 = vpop.f32.mrb[7].mxu0  ;;  %1536 = vmatprep.subr.bf16.mxu1 %v1835_v0 }
  0xf9   :  { %1537 = vmatpush3.bf16.msra.mxu1 %v1753_v39 }
  0xfa   :  { %1538 = vmatprep.subr.bf16.mxu1 %v1835_v0 }
  0xfb   :  { %v417_v40 = vpop.f32.mrb[8].mxu0 }
  0xfc   :  { %v1558_v41 = vpop.f32.mrb[9].mxu0  ;;  %v1727_v42 = vpack.i.bf16 %v417_v40, %v412_v33 }
  0xfd   :  { %v420_v43 = vpop.f32.mrb[10].mxu0  ;;  %1539 = vmatpush3.bf16.msra.mxu1 %v1754_v44 }
  0xfe   :  { %1728 = vrot.lane.b32.xlu0 %v1727_v42, %s1833_s28  ;;  %v1559_v45 = vpop.f32.mrb[11].mxu0  ;;  %1540 = vmatprep.subr.bf16.mxu1 %v1835_v0 }
 0x101   :  { %1541 = vmatpush3.bf16.msra.mxu1 %v1755_v46  ;;  %v1772_v46 = vld [vmem:[#allocation2 + $0xe0] sm:$0xff]  }
 0x102   :  { %431 = vrot.lane.b32.xlu0 %v420_v43, %s1833_s28  ;;  %1580 = vmatprep.subr.bf16.mxu1 %v1756_v47 }
 0x104   :  { %1543 = vmatmul.mubr.msk.bf16.vlgmr.msra.gmra.mrb[8].mxu1 %vm288_vm4, %v1890_v1 }
 0x105   :  { %1581 = vmatpush3.bf16.msra.mxu1 %v1756_v47  ;;  %1596 = vmatprep.mubr.bf16.mxu1 %v1901_v3  ;;  %v1773_v47 = vld [vmem:[#allocation2 + $0xe8] sm:$0xff]  }
 0x106   :  { %1582 = vmatprep.subr.bf16.mxu1 %v1758_v48 }
 0x109   :  { %1583 = vmatpush3.bf16.msra.mxu1 %v1758_v48  ;;  %v1774_v48 = vld [vmem:[#allocation2 + $0xf0] sm:$0xff]  }
 0x10a   :  { %1584 = vmatprep.subr.bf16.mxu1 %v1760_v49 }
 0x10d   :  { %1585 = vmatpush3.bf16.msra.mxu1 %v1760_v49  ;;  %v1775_v49 = vld [vmem:[#allocation2 + $0xf8] sm:$0xff]  }
 0x10e   :  { %1586 = vmatprep.subr.bf16.mxu1 %v1762_v50 }
 0x111   :  { %1587 = vmatpush3.bf16.msra.mxu1 %v1762_v50  ;;  %v1784_v50 = vld [vmem:[#allocation2 + $0x180] sm:$0xff]  }
 0x112   :  { %1588 = vmatprep.subr.bf16.mxu1 %v1764_v51 }
 0x115   :  { %1589 = vmatpush3.bf16.msra.mxu1 %v1764_v51  ;;  %v1792_v51 = vld [vmem:[#allocation2 + $0x140] sm:$0xff]  }
 0x116   :  { %1590 = vmatprep.subr.bf16.mxu1 %v1766_v52 }
 0x119   :  { %1591 = vmatpush3.bf16.msra.mxu1 %v1766_v52  ;;  %v1793_v52 = vld [vmem:[#allocation2 + $0x148] sm:$0xff]  }
 0x11a   :  { %1592 = vmatprep.subr.bf16.mxu1 %v1768_v53 }
 0x11d   :  { %1593 = vmatpush3.bf16.msra.mxu1 %v1768_v53  ;;  %v1795_v53 = vld [vmem:[#allocation2 + $0x158] sm:$0xff]  }
 0x11e   :  { %1594 = vmatprep.subr.bf16.mxu1 %v1770_v54 }
 0x121   :  { %1595 = vmatpush3.bf16.msra.mxu1 %v1770_v54  ;;  %v1797_v54 = vld [vmem:[#allocation2 + $0x168] sm:$0xff]  }
 0x122   :  { %1608 = vmatprep.subr.bf16.mxu1 %v1835_v0 }
 0x124   :  { %1597 = vmatmul.mubr.bf16.vlgmr.msra.gmra.mrb[12].mxu1 %v1908_v4 }
 0x125   :  { %1624 = vmatprep.mubr.msk.bf16.mxu1 %vm1836_vm0, %v1835_v0  ;;  %1609 = vmatpush3.bf16.msra.mxu1 %v1776_v25 }
 0x126   :  { %1610 = vmatprep.subr.bf16.mxu1 %v1835_v0 }
 0x170   :  { %v1729_v55 = vpop.permute.xlu0 %1728 }
 0x171   :  { %v1731_v56 = vunpack.i.h.bf16 %v1729_v55  ;;  %v1730_v57 = vunpack.i.l.bf16 %v1729_v55 }
 0x173   :  { %v436_v58 = vsel %vm288_vm4, %v1950_v24, %v1730_v57  ;;  %v437_v59 = vsel %vm288_vm4, %v1952_v26, %v1731_v56  ;;  %v1777_v26 = vld [vmem:[#allocation2 + $0x108] sm:$0xff]  }
 0x174   :  { %v432_v60 = vpop.permute.xlu0 %431  ;;  %v439_v61 = vpack.c.bf16 %v437_v59, %v436_v58  ;;  %1611 = vmatpush3.bf16.msra.mxu1 %v1777_v26 }
 0x175   :  { %v438_v62 = vsel %vm288_vm4, %v1954_v29, %v432_v60  ;;  %1612 = vmatprep.subr.bf16.mxu1 %v1835_v0  ;;  %v1780_v29 = vld [vmem:[#allocation2 + $0x120] sm:$0xff]   ;;  %v1785_v60 = vld [vmem:[#allocation2 + $0x188] sm:$0xff]  }
 0x176   :  { %v440_v63 = vpack.c.bf16 %v438_v62, %v438_v62  ;;  %1576 = vmatprep.mubr.bf16.mxu0 %v439_v61  ;;  %v1786_v61 = vld [vmem:[#allocation2 + $0x190] sm:$0xff]   ;;  %v1787_v62 = vld [vmem:[#allocation2 + $0x198] sm:$0xff]  }
 0x178   :  { %1577 = vmatmul.mubr.bf16.vlgmr.msra.gmra.mrb[12].mxu0 %v440_v63  ;;  %1613 = vmatpush3.bf16.msra.mxu1 %v1778_v27  ;;  %v1788_v63 = vld [vmem:[#allocation2 + $0x1a0] sm:$0xff]  }
 0x179   :  { %1604 = vmatprep.mubr.msk.bf16.mxu0 %vm1836_vm0, %v1835_v0  ;;  %1614 = vmatprep.subr.bf16.mxu1 %v1835_v0 }
 0x17c   :  { %1615 = vmatpush3.bf16.msra.mxu1 %v1779_v28 }
 0x17d   :  { %1616 = vmatprep.subr.bf16.mxu1 %v1835_v0 }
 0x180   :  { %1617 = vmatpush3.bf16.msra.mxu1 %v1780_v29 }
 0x181   :  { %1618 = vmatprep.subr.bf16.mxu1 %v1835_v0 }
 0x184   :  { %1619 = vmatpush3.bf16.msra.mxu1 %v1781_v30 }
 0x185   :  { %1620 = vmatprep.subr.bf16.mxu1 %v1835_v0 }
 0x188   :  { %1621 = vmatpush3.bf16.msra.mxu1 %v1782_v31 }
 0x189   :  { %1622 = vmatprep.subr.bf16.mxu1 %v1835_v0 }
 0x1c7   :  { %v252_v1 = vpop.f32.mrb[4].mxu1 }
 0x1c8   :  { %v1532_v3 = vpop.f32.mrb[5].mxu1 }
 0x1c9   :  { %v255_v4 = vpop.f32.mrb[6].mxu1 }
 0x1ca   :  { %v1533_v6 = vpop.f32.mrb[7].mxu1 }
 0x1d7   :  { %v326_v10 = vpop.f32.mrb[8].mxu1 }
 0x1d8   :  { %v327_v11 = vadd.f32 %v326_v10, %v252_v1  ;;  %v1544_v12 = vpop.f32.mrb[9].mxu1  ;;  %v1790_v10 = vld [vmem:[#allocation2 + $0x1b0] sm:$0xff]  }
 0x1d9   :  { %v329_v13 = vpop.f32.mrb[10].mxu1 }
 0x1da   :  { %v337_v14 = vadd.f32 %v1344_v9, %v327_v11  ;;  %v330_v15 = vadd.f32 %v329_v13, %v255_v4  ;;  %v1545_v16 = vpop.f32.mrb[11].mxu1 }
 0x1db   :  { %v1799_v16 = vld [vmem:[#allocation2 + $0x178] sm:$0xff]  }
 0x1dc   :  { %v339_v17 = vmax.f32 %v337_v14, 0.0  ;;  %v338_v18 = vadd.f32 %v1344_v9, %v330_v15  ;;  %v1789_v9 = vld [vmem:[#allocation2 + $0x1a8] sm:$0xff]   ;;  %v1791_v15 = vld [vmem:[#allocation2 + $0x1b8] sm:$0xff]  }
 0x1de   :  { %v340_v19 = vmax.f32 %v338_v18, 0.0 }
 0x1e0   :  { %v641_v20 = vpack.c.bf16 %v340_v19, %v339_v17 }
 0x1f7   :  { %v1598_v21 = vpop.f32.mrb[12].mxu1 }
 0x1f8   :  { %v620_v22 = vpop.f32.mrb[13].mxu1 }
 0x1f9   :  { %v1599_v23 = vpop.f32.mrb[14].mxu1 }
 0x1fa   :  { %v623_v24 = vpop.f32.mrb[15].mxu1 }
 0x24b   :  { %v1578_v32 = vpop.f32.mrb[12].mxu0 }
 0x24c   :  { %v629_v33 = vadd.f32 %v1598_v21, %v1578_v32  ;;  %v523_v34 = vpop.f32.mrb[13].mxu0 }
 0x24d   :  { %v621_v36 = vadd.f32 %v620_v22, %v523_v34  ;;  %v1579_v37 = vpop.f32.mrb[14].mxu0  ;;  %v1800_v34 = vld [vmem:[#allocation2 + $0x1c0] sm:$0xff]  }
 0x24e   :  { %v526_v38 = vpop.f32.mrb[15].mxu0  ;;  %v640_v40 = vadd.f32 %v1367_v35, %v629_v33  ;;  %v1802_v37 = vld [vmem:[#allocation2 + $0x1d0] sm:$0xff]  }
 0x24f   :  { %v624_v39 = vadd.f32 %v623_v24, %v526_v38  ;;  %v638_v41 = vadd.f32 %v1367_v35, %v621_v36  ;;  %v1801_v36 = vld [vmem:[#allocation2 + $0x1c8] sm:$0xff]   ;;  %v1803_v38 = vld [vmem:[#allocation2 + $0x1d8] sm:$0xff]  }
 0x250   :  { %v1992_v44 = vpack.c.bf16 %v640_v40, %v640_v40  ;;  %v1805_v40 = vld [vmem:[#allocation2 + $0x1e8] sm:$0xff]  }
 0x251   :  { %v639_v42 = vadd.f32 %v1367_v35, %v624_v39  ;;  %v1804_v39 = vld [vmem:[#allocation2 + $0x1e0] sm:$0xff]  }
 0x252   :  { %v703_v45 = vsel %vm124_vm2, %v1992_v44, 0 }
 0x253   :  { %v642_v43 = vpack.c.bf16 %v639_v42, %v638_v41  ;;  %v1806_v41 = vld [vmem:[#allocation2 + $0x1f0] sm:$0xff]   ;;  %v1807_v42 = vld [vmem:[#allocation2 + $0x1f8] sm:$0xff]  }
 0x255   :  { %1601 = vmatpush3.bf16.msra.mxu0 %v642_v43 }
 0x256   :  { %1602 = vmatprep.subr.bf16.mxu0 %v1835_v0 }
 0x259   :  { %1603 = vmatpush3.bf16.msra.mxu0 %v703_v45 }
 0x25a   :  { %1628 = vmatprep.subr.bf16.mxu0 %v1835_v0 }
 0x25c   :  { %1605 = vmatmul.mubr.msk.bf16.vlgmr.msra.gmra.mrb[16].mxu0 %vm120_vm3, %v1924_v7  ;;  %v1783_v7 = vld [vmem:[#allocation2 + $0x138] sm:$0xff]  }
 0x25d   :  { %1629 = vmatpush3.bf16.msra.mxu0 %v1772_v46  ;;  %1636 = vmatprep.mubr.msk.bf16.mxu0 %vm1836_vm0, %v1835_v0  ;;  %v1382_v46 = vld [vmem:[%s2079_s4 + $0x2] ss:$0 sm:$0xff] }
 0x25e   :  { %1630 = vmatprep.subr.bf16.mxu0 %v1835_v0  ;;  %1623 = vmatpush3.bf16.msra.mxu1 %v1783_v7 }
 0x25f   :  { %1674 = vmatprep.subr.bf16.mxu1 %v1784_v50 }
 0x261   :  { %1631 = vmatpush3.bf16.msra.mxu0 %v1773_v47 }
 0x262   :  { %1632 = vmatprep.subr.bf16.mxu0 %v1835_v0 }
 0x265   :  { %1633 = vmatpush3.bf16.msra.mxu0 %v1774_v48 }
 0x266   :  { %1634 = vmatprep.subr.bf16.mxu0 %v1835_v0 }
 0x269   :  { %1635 = vmatpush3.bf16.msra.mxu0 %v1775_v49 }
 0x26a   :  { %1640 = vmatprep.subr.bf16.mxu0 %v1835_v0 }
 0x26c   :  { %1637 = vmatmul.mubr.msk.bf16.vlgmr.msra.gmra.mrb[20].mxu0 %vm288_vm4, %v641_v20 }
 0x26d   :  { %1641 = vmatpush3.bf16.msra.mxu0 %v641_v20  ;;  %1642 = vmatprep.mubr.msk.bf16.mxu0 %vm1836_vm0, %v1835_v0 }
 0x26e   :  { %1654 = vmatprep.subr.bf16.mxu0 %v1792_v51 }
 0x274   :  { %1643 = vmatmul.mubr.msk.bf16.vlgmr.msra.gmra.mrb[24].mxu0 %vm357_vm1, %v1895_v2  ;;  %v1794_v2 = vld [vmem:[#allocation2 + $0x150] sm:$0xff]  }
 0x275   :  { %1646 = vmatprep.mubr.msk.bf16.mxu0 %vm1836_vm0, %v1835_v0  ;;  %1655 = vmatpush3.bf16.msra.mxu0 %v1792_v51 }
 0x276   :  { %1656 = vmatprep.subr.bf16.mxu0 %v1793_v52 }
 0x279   :  { %1657 = vmatpush3.bf16.msra.mxu0 %v1793_v52 }
 0x27a   :  { %1658 = vmatprep.subr.bf16.mxu0 %v1794_v2 }
 0x27c   :  { %1647 = vmatmul.mubr.msk.bf16.gmra.mrb[28].mxu0 %vm357_vm1, %v1916_v5  ;;  %v1796_v5 = vld [vmem:[#allocation2 + $0x160] sm:$0xff]  }
 0x27d   :  { %1650 = vmatprep.mubr.msk.bf16.mxu0 %vm1836_vm0, %v1835_v0  ;;  %1659 = vmatpush3.bf16.msra.mxu0 %v1794_v2 }
 0x27e   :  { %1660 = vmatprep.subr.bf16.mxu0 %v1795_v53 }
 0x281   :  { %1661 = vmatpush3.bf16.msra.mxu0 %v1795_v53 }
 0x282   :  { %1662 = vmatprep.subr.bf16.mxu0 %v1796_v5 }
 0x284   :  { %1651 = vmatmul.mubr.msk.bf16.gmra.mrb[32].mxu0 %vm357_vm1, %v1938_v8  ;;  %v1798_v8 = vld [vmem:[#allocation2 + $0x170] sm:$0xff]  }
 0x285   :  { %1663 = vmatpush3.bf16.msra.mxu0 %v1796_v5 }
 0x286   :  { %1664 = vmatprep.subr.bf16.mxu0 %v1797_v54 }
 0x289   :  { %1665 = vmatpush3.bf16.msra.mxu0 %v1797_v54 }
 0x28a   :  { %1666 = vmatprep.subr.bf16.mxu0 %v1798_v8 }
 0x28d   :  { %1667 = vmatpush3.bf16.msra.mxu0 %v1798_v8 }
 0x28e   :  { %1668 = vmatprep.subr.bf16.mxu0 %v1799_v16 }
 0x291   :  { %1669 = vmatpush3.bf16.msra.mxu0 %v1799_v16 }
 0x292   :  { %1694 = vmatprep.subr.bf16.mxu0 %v1835_v0 }
 0x32f   :  { %v739_v55 = vpop.f32.mrb[16].mxu0 }
 0x330   :  { %v1606_v56 = vpop.f32.mrb[17].mxu0 }
 0x331   :  { %v742_v57 = vpop.f32.mrb[18].mxu0 }
 0x332   :  { %v746_v58 = vpack.c.bf16 %v742_v57, %v739_v55  ;;  %v1607_v59 = vpop.f32.mrb[19].mxu0 }
 0x334   :  { %1625 = vmatmul.mubr.bf16.vlgmr.msra.gmra.mrb[16].mxu1 %v746_v58  ;;  %v1402_v58 = vld [vmem:[%s2079_s4 + $0x3] ss:$0 sm:$0xff] }
 0x335   :  { %1675 = vmatpush3.bf16.msra.mxu1 %v1784_v50  ;;  %1690 = vmatprep.mubr.bf16.mxu1 %v642_v43 }
 0x336   :  { %1676 = vmatprep.subr.bf16.mxu1 %v1785_v60 }
 0x339   :  { %1677 = vmatpush3.bf16.msra.mxu1 %v1785_v60 }
 0x33a   :  { %1678 = vmatprep.subr.bf16.mxu1 %v1786_v61 }
 0x33d   :  { %1679 = vmatpush3.bf16.msra.mxu1 %v1786_v61 }
 0x33e   :  { %1680 = vmatprep.subr.bf16.mxu1 %v1787_v62 }
 0x33f   :  { %v2019_v1 = vpop.f32.mrb[20].mxu0 }
 0x340   :  { %v1638_v3 = vpop.f32.mrb[21].mxu0 }
 0x341   :  { %1681 = vmatpush3.bf16.msra.mxu1 %v1787_v62  ;;  %v2021_v4 = vpop.f32.mrb[22].mxu0 }
 0x342   :  { %v1639_v6 = vpop.f32.mrb[23].mxu0  ;;  %1682 = vmatprep.subr.bf16.mxu1 %v1788_v63 }
 0x345   :  { %1683 = vmatpush3.bf16.msra.mxu1 %v1788_v63 }
 0x346   :  { %1684 = vmatprep.subr.bf16.mxu1 %v1789_v9 }
 0x347   :  { %v944_v11 = vpop.f32.mrb[24].mxu0 }
 0x348   :  { %v1644_v12 = vpop.f32.mrb[25].mxu0 }
 0x349   :  { %1685 = vmatpush3.bf16.msra.mxu1 %v1789_v9  ;;  %v947_v13 = vpop.f32.mrb[26].mxu0 }
 0x34a   :  { %v1645_v14 = vpop.f32.mrb[27].mxu0  ;;  %1686 = vmatprep.subr.bf16.mxu1 %v1790_v10 }
 0x34d   :  { %1687 = vmatpush3.bf16.msra.mxu1 %v1790_v10 }
 0x34e   :  { %1688 = vmatprep.subr.bf16.mxu1 %v1791_v15 }
 0x34f   :  { %v952_v17 = vpop.f32.mrb[28].mxu0 }
 0x350   :  { %v1648_v18 = vpop.f32.mrb[29].mxu0 }
 0x351   :  { %1689 = vmatpush3.bf16.msra.mxu1 %v1791_v15  ;;  %v955_v19 = vpop.f32.mrb[30].mxu0 }
 0x352   :  { %v1649_v20 = vpop.f32.mrb[31].mxu0 }
 0x354   :  { %1691 = vmatmul.mubr.bf16.vlgmr.msra.gmra.mrb[20].mxu1 %v1992_v44 }
 0x357   :  { %v960_v21 = vpop.f32.mrb[32].mxu0 }
 0x358   :  { %v1652_v22 = vpop.f32.mrb[33].mxu0  ;;  %v1732_v23 = vpack.i.bf16 %v960_v21, %v955_v19 }
 0x359   :  { %v963_v24 = vpop.f32.mrb[34].mxu0 }
 0x35a   :  { %1733 = vrot.lane.b32.xlu1 %v1732_v23, %s1833_s28  ;;  %v1653_v25 = vpop.f32.mrb[35].mxu0 }
 0x35e   :  { %974 = vrot.lane.b32.xlu1 %v963_v24, %s1833_s28 }
 0x3cc   :  { %v1734_v26 = vpop.permute.xlu1 %1733 }
 0x3cd   :  { %v1736_v27 = vunpack.i.h.bf16 %v1734_v26  ;;  %v1735_v28 = vunpack.i.l.bf16 %v1734_v26 }
 0x3cf   :  { %v979_v29 = vsel %vm288_vm4, %v944_v11, %v1735_v28  ;;  %v980_v30 = vsel %vm288_vm4, %v947_v13, %v1736_v27 }
 0x3d0   :  { %v975_v31 = vpop.permute.xlu1 %974  ;;  %v982_v32 = vpack.c.bf16 %v980_v30, %v979_v29 }
 0x3d1   :  { %v981_v33 = vsel %vm288_vm4, %v952_v17, %v975_v31 }
 0x3d2   :  { %v983_v35 = vpack.c.bf16 %v981_v33, %v981_v33  ;;  %1670 = vmatprep.mubr.bf16.mxu0 %v982_v32 }
 0x3d4   :  { %1671 = vmatmul.mubr.bf16.vlgmr.msra.gmra.mrb[36].mxu0 %v983_v35 }
 0x3d5   :  { %1695 = vmatpush3.bf16.msra.mxu0 %v1800_v34  ;;  %1710 = vmatprep.mubr.msk.bf16.mxu0 %vm1836_vm0, %v1835_v0 }
 0x3d6   :  { %1696 = vmatprep.subr.bf16.mxu0 %v1835_v0 }
 0x3d9   :  { %1697 = vmatpush3.bf16.msra.mxu0 %v1801_v36 }
 0x3da   :  { %1698 = vmatprep.subr.bf16.mxu0 %v1835_v0 }
 0x3dd   :  { %1699 = vmatpush3.bf16.msra.mxu0 %v1802_v37 }
 0x3de   :  { %1700 = vmatprep.subr.bf16.mxu0 %v1835_v0 }
 0x3e1   :  { %1701 = vmatpush3.bf16.msra.mxu0 %v1803_v38 }
 0x3e2   :  { %1702 = vmatprep.subr.bf16.mxu0 %v1835_v0 }
 0x3e5   :  { %1703 = vmatpush3.bf16.msra.mxu0 %v1804_v39 }
 0x3e6   :  { %1704 = vmatprep.subr.bf16.mxu0 %v1835_v0 }
 0x3e9   :  { %1705 = vmatpush3.bf16.msra.mxu0 %v1805_v40 }
 0x3ea   :  { %1706 = vmatprep.subr.bf16.mxu0 %v1835_v0 }
 0x3ed   :  { %1707 = vmatpush3.bf16.msra.mxu0 %v1806_v41 }
 0x3ee   :  { %1708 = vmatprep.subr.bf16.mxu0 %v1835_v0 }
 0x3f1   :  { %1709 = vmatpush3.bf16.msra.mxu0 %v1807_v42 }
 0x407   :  { %v829_v43 = vpop.f32.mrb[16].mxu1 }
 0x408   :  { %v898_v44 = vadd.f32 %v2019_v1, %v829_v43  ;;  %v1626_v45 = vpop.f32.mrb[17].mxu1 }
 0x409   :  { %v832_v47 = vpop.f32.mrb[18].mxu1 }
 0x40a   :  { %v901_v48 = vadd.f32 %v2021_v4, %v832_v47  ;;  %v1627_v49 = vpop.f32.mrb[19].mxu1  ;;  %v908_v7 = vadd.f32 %v1382_v46, %v898_v44  ;;  %v1403_v4 = vld [vmem:[%s2079_s4 + $0x4] ss:$0 sm:$0xff] }
 0x40c   :  { %v909_v50 = vadd.f32 %v1382_v46, %v901_v48 }
 0x40e   :  { %v1183_v51 = vpack.c.bf16 %v909_v50, %v908_v7 }
 0x410   :  { %1711 = vmatmul.mubr.msk.bf16.vlgmr.msra.gmra.mrb[40].mxu0 %vm288_vm4, %v1183_v51 }
 0x411   :  { %1714 = vmatprep.mubr.msk.bf16.mxu0 %vm1836_vm0, %v1835_v0 }
 0x427   :  { %v1692_v52 = vpop.f32.mrb[20].mxu1 }
 0x428   :  { %v1162_v2 = vpop.f32.mrb[21].mxu1 }
 0x429   :  { %v1693_v53 = vpop.f32.mrb[22].mxu1 }
 0x42a   :  { %v1165_v5 = vpop.f32.mrb[23].mxu1 }
 0x4a7   :  { %v1672_v54 = vpop.f32.mrb[36].mxu0 }
 0x4a8   :  { %v1171_v8 = vadd.f32 %v1692_v52, %v1672_v54  ;;  %v1066_v55 = vpop.f32.mrb[37].mxu0 }
 0x4a9   :  { %v1163_v56 = vadd.f32 %v1162_v2, %v1066_v55  ;;  %v1673_v57 = vpop.f32.mrb[38].mxu0 }
 0x4aa   :  { %v1069_v59 = vpop.f32.mrb[39].mxu0  ;;  %v1182_v1 = vadd.f32 %v1402_v58, %v1171_v8 }
 0x4ab   :  { %v1166_v60 = vadd.f32 %v1165_v5, %v1069_v59  ;;  %v1180_v61 = vadd.f32 %v1402_v58, %v1163_v56 }
 0x4ac   :  { %v1185_v3 = vpack.c.bf16 %v1182_v1, %v1182_v1 }
 0x4ad   :  { %v1181_v62 = vadd.f32 %v1402_v58, %v1166_v60 }
 0x4af   :  { %v1184_v63 = vpack.c.bf16 %v1181_v62, %v1180_v61 }
 0x4b1   :  { %1715 = vmatmul.mubr.bf16.gmra.mrb[44].mxu0 %v1184_v63 }
 0x4b2   :  { %1718 = vmatprep.mubr.msk.bf16.mxu0 %vm1836_vm0, %v1835_v0 }
 0x4b9   :  { %1719 = vmatmul.mubr.bf16.gmra.mrb[48].mxu0 %v1185_v3 }
 0x4e3   :  { %v1293_v6 = vpop.f32.mrb[40].mxu0 }
 0x4e4   :  { %v1294_v9 = vadd.f32 %v1403_v4, %v1293_v6  ;;  %v1712_v10 = vpop.f32.mrb[41].mxu0 }
 0x4e5   :  { %v1296_v11 = vpop.f32.mrb[42].mxu0 }
 0x4e6   :  { %1316 = vst.msk [vmem:[%s2080_s5] sm:$0xff] %vm1315_vm5, %v1294_v9  ;;  %v1297_v12 = vadd.f32 %v1403_v4, %v1296_v11  ;;  %v1713_v13 = vpop.f32.mrb[43].mxu0 }
 0x4e8   :  { %1317 = vst.msk [vmem:[%s2080_s5 + $0x8] sm:$0xff] %vm1315_vm5, %v1297_v12 }
 0x584   :  { %v1301_v0 = vpop.f32.mrb[44].mxu0 }
 0x585   :  { %v1302_v14 = vadd.f32 %v1403_v4, %v1301_v0  ;;  %v1716_v15 = vpop.f32.mrb[45].mxu0 }
 0x586   :  { %v1304_v16 = vpop.f32.mrb[46].mxu0 }
 0x587   :  { %1318 = vst.msk [vmem:[%s2080_s5 + $0x10] sm:$0xff] %vm1315_vm5, %v1302_v14  ;;  %v1305_v17 = vadd.f32 %v1403_v4, %v1304_v16  ;;  %v1717_v18 = vpop.f32.mrb[47].mxu0 }
 0x589   :  { %1319 = vst.msk [vmem:[%s2080_s5 + $0x18] sm:$0xff] %vm1315_vm5, %v1305_v17 }
 0x58c   :  { %v1309_v19 = vpop.f32.mrb[48].mxu0 }
 0x58d   :  { %v1310_v20 = vadd.f32 %v1403_v4, %v1309_v19  ;;  %v1720_v21 = vpop.f32.mrb[49].mxu0 }
 0x58e   :  { %v1312_v22 = vpop.f32.mrb[50].mxu0 }
 0x58f   :  { %1320 = vst.msk [vmem:[%s2080_s5 + $0x20] sm:$0xff] %vm1315_vm5, %v1310_v20  ;;  %v1721_v23 = vpop.f32.mrb[51].mxu0 }
 0x590   :  { %1325 = vsyncpa [#allocation3], 1 }

</bundles_post_ra>
